<compile_context>
chip_gen: v7x
topology: tpu7x:2x2x1
jax: 0.10.0
libtpu: 0.0.40
codegen_flags: <defaults>
</compile_context>

<pallas_src>
import functools

import jax
import jax.numpy as jnp
from jax.experimental import pallas as pl
from jax.experimental.pallas import tpu as pltpu


# dynamics constants (folded at trace time)
_G = 0.81          # matches the original module (spec uses 0.81, not 9.81)
_M = 0.15
_L = 0.5
_MGL = _M * _G * _L
_INV_ML2 = 1.0 / (_M * _L * _L)
_TOLERANCE = 0.01


# ------------------------- Pallas kernel -------------------------------------
def _inverted_pendulum_kernel(x_ref, wpack_ref, out_ref):
    # x_ref:     (2, TB)  f32  -- row 0 = theta, row 1 = dtheta (batch on lanes)
    # wpack_ref: (8, 128) f32  -- packed weights (see wrapper for layout)
    # out_ref:   (2, TB)  f32  -- row 0 = V, row 1 = Lyapunov-decrease term

    x = x_ref[...]                         # (2, TB)
    wp = wpack_ref[...]                    # (8, 128) -- one vreg

    # unpack weight columns (tiny, once per grid step)
    w1c0 = wp[0:6, 0:1]                    # (6, 1)  = W1[:, 0]
    w1c1 = wp[0:6, 1:2]                    # (6, 1)  = W1[:, 1]
    b1c = wp[0:6, 2:3]                     # (6, 1)  = b1
    w2c = wp[0:6, 3:4]                     # (6, 1)  = W2[0, :]
    b2s = wp[0:1, 4:5]                     # (1, 1)  = b2
    wu0 = wp[0:1, 5:6]                     # (1, 1)  = Wu[0, 0]
    wu1 = wp[0:1, 6:7]                     # (1, 1)  = Wu[0, 1]

    theta = x[0:1, :]                      # (1, TB)
    dtheta = x[1:2, :]                     # (1, TB)

    # --- V = Linear(2,6) -> Tanh -> Linear(6,1) -> Tanh (unrolled on VPU) ----
    h1 = w1c0 * theta + w1c1 * dtheta + b1c            # (6, TB)
    t1 = jnp.tanh(h1)                                   # (6, TB)
    h2 = jnp.sum(w2c * t1, axis=0, keepdims=True) + b2s  # (1, TB)
    V = jnp.tanh(h2)                                    # (1, TB)

    # --- control head u = Linear(2,1, bias=False) ----------------------------
    u = wu0 * theta + wu1 * dtheta                      # (1, TB)

    # --- manual Jacobian grad = dV/dx (reverse pass, unrolled) ----------------
    g_v = 1.0 - V * V                                   # (1, TB)   Tanh'
    g6 = (g_v * w2c) * (1.0 - t1 * t1)                  # (6, TB)   @W2 then Tanh'
    grad0 = jnp.sum(g6 * w1c0, axis=0, keepdims=True)   # (1, TB)   dV/dtheta
    grad1 = jnp.sum(g6 * w1c1, axis=0, keepdims=True)   # (1, TB)   dV/ddtheta

    # --- pendulum dynamics ----------------------------------------------------
    ddtheta = (_MGL * jnp.sin(theta) + u - 0.1 * dtheta) * _INV_ML2  # (1, TB)

    lyap = -(grad0 * dtheta + grad1 * ddtheta) + _TOLERANCE          # (1, TB)

    out_ref[0:1, :] = V
    out_ref[1:2, :] = lyap


# ------------------------- wrapper --------------------------------------------
def _round_up(a, b):
    return (a + b - 1) // b * b


@functools.partial(jax.jit, static_argnames=("block_b",))
def inverted_pendulum_forward(x, w1, b1, w2, b2, wu, *, block_b=2048):
    """x: (B, 2) float32.  Returns (B, 2) = [V, Lyapunov-decrease term]."""
    assert block_b % 128 == 0, "batch tile must be a multiple of 128 lanes"
    B = x.shape[0]

    # effective lane tile: at most block_b, at least 128, multiple of 128
    tb = min(block_b, _round_up(B, 128))
    Bp = _round_up(B, tb)

    # transpose to batch-on-lane layout and pad batch to a tile multiple
    xt = jnp.transpose(x).astype(jnp.float32)           # (2, B)
    if Bp != B:
        xt = jnp.pad(xt, ((0, 0), (0, Bp - B)))          # (2, Bp)

    # pack all weights into one (8, 128) f32 tile (exactly one vreg)
    wpack = jnp.zeros((8, 128), jnp.float32)
    wpack = wpack.at[0:6, 0].set(w1[:, 0].astype(jnp.float32))
    wpack = wpack.at[0:6, 1].set(w1[:, 1].astype(jnp.float32))
    wpack = wpack.at[0:6, 2].set(b1.reshape(6).astype(jnp.float32))
    wpack = wpack.at[0:6, 3].set(w2.reshape(6).astype(jnp.float32))
    wpack = wpack.at[0, 4].set(b2.reshape(()).astype(jnp.float32))
    wpack = wpack.at[0, 5].set(wu.reshape(2)[0].astype(jnp.float32))
    wpack = wpack.at[0, 6].set(wu.reshape(2)[1].astype(jnp.float32))

    grid = (Bp // tb,)

    out_t = pl.pallas_call(
        _inverted_pendulum_kernel,
        out_shape=jax.ShapeDtypeStruct((2, Bp), jnp.float32),
        grid_spec=pltpu.PrefetchScalarGridSpec(
            num_scalar_prefetch=0,
            grid=grid,
            in_specs=[
                pl.BlockSpec((2, tb), lambda i: (0, i)),     # x^T batch tile
                pl.BlockSpec((8, 128), lambda i: (0, 0)),    # packed weights
            ],
            out_specs=pl.BlockSpec((2, tb), lambda i: (0, i)),
        ),
        compiler_params=pltpu.CompilerParams(
            dimension_semantics=("parallel",)),
    )(xt, wpack)

    return jnp.transpose(out_t[:, :B])                   # (B, 2)


# ------------------------- pure-JAX reference ----------------------------------
def reference_forward(x, w1, b1, w2, b2, wu):
    h1 = x @ w1.T + b1
    t1 = jnp.tanh(h1)
    h2 = t1 @ w2.T + b2
    V = jnp.tanh(h2)
    u = x @ wu.T
    grad = 1.0 - jnp.tanh(h2) ** 2
    grad = grad @ w2
    grad = grad * (1.0 - jnp.tanh(h1) ** 2)
    grad = grad @ w1
    theta = x[:, 0:1]
    dtheta = x[:, 1:2]
    g, m, l = 0.81, 0.15, 0.5
    dyn = jnp.concatenate(
        [dtheta, (m * g * l * jnp.sin(theta) + u - 0.1 * dtheta) / (m * l * l)],
        axis=-1)
    return jnp.concatenate(
        [V, -jnp.sum(grad * dyn, axis=-1, keepdims=True) + 0.01], axis=-1)


if __name__ == "__main__":
    key = jax.random.PRNGKey(0)
    k_x, k_w1, k_b1, k_w2, k_b2, k_wu = jax.random.split(key, 6)

    # small test: B deliberately not a multiple of 128 to exercise padding,
    # block_b=128 gives a 3-step grid (exercises pipelining / megacore path).
    B = 300
    x = jax.random.normal(k_x, (B, 2), dtype=jnp.float32)
    w1 = jax.random.uniform(k_w1, (6, 2), jnp.float32, -0.7, 0.7)   # Linear(2,6).weight
    b1 = jax.random.uniform(k_b1, (6,), jnp.float32, -0.7, 0.7)     # Linear(2,6).bias
    w2 = jax.random.uniform(k_w2, (1, 6), jnp.float32, -0.4, 0.4)   # Linear(6,1).weight
    b2 = jax.random.uniform(k_b2, (1,), jnp.float32, -0.4, 0.4)     # Linear(6,1).bias
    wu = jax.random.uniform(k_wu, (1, 2), jnp.float32, -0.7, 0.7)   # u: Linear(2,1,no bias)

    out = inverted_pendulum_forward(x, w1, b1, w2, b2, wu, block_b=128)
    out = jax.block_until_ready(out)

    ref = reference_forward(x, w1, b1, w2, b2, wu)
    assert out.shape == (B, 2)
    assert jnp.allclose(out, ref, atol=1e-4, rtol=1e-4), (out, ref)

    print("KERNEL_OK")
</pallas_src>

<mosaic_0001>
module attributes {stable_mosaic.version = 11 : i64} {
  func.func @_inverted_pendulum_kernel(%arg0: i32, %arg1: memref<2x128xf32, #tpu.memory_space<vmem>>, %arg2: memref<8x128xf32, #tpu.memory_space<vmem>>, %arg3: memref<2x128xf32, #tpu.memory_space<vmem>>) attributes {dimension_semantics = [#tpu.dimension_semantics<parallel>], iteration_bounds = array<i64: 3>, scalar_prefetch = 0 : i64, scratch_operands = 0 : i64, tpu.core_type = #tpu.core_type<tc>, window_params = [{transform_indices = @transform_0, window_bounds = array<i64: 2, 128>}, {pipeline_mode = #tpu.pipeline_mode<synchronous>, transform_indices = @transform_1, window_bounds = array<i64: 8, 128>}, {transform_indices = @transform_2, window_bounds = array<i64: 2, 128>}]} {
    %c0 = arith.constant 0 : index
    %c0_0 = arith.constant 0 : index
    %0 = vector.load %arg1[%c0, %c0_0] : memref<2x128xf32, #tpu.memory_space<vmem>>, vector<2x128xf32>
    %c0_1 = arith.constant 0 : index
    %c0_2 = arith.constant 0 : index
    %1 = vector.load %arg2[%c0_1, %c0_2] : memref<8x128xf32, #tpu.memory_space<vmem>>, vector<8x128xf32>
    %2 = vector.extract_strided_slice %1 {offsets = [0, 0], sizes = [6, 1], strides = [1, 1]} : vector<8x128xf32> to vector<6x1xf32>
    %3 = vector.extract_strided_slice %1 {offsets = [0, 1], sizes = [6, 1], strides = [1, 1]} : vector<8x128xf32> to vector<6x1xf32>
    %4 = vector.extract_strided_slice %1 {offsets = [0, 2], sizes = [6, 1], strides = [1, 1]} : vector<8x128xf32> to vector<6x1xf32>
    %5 = vector.extract_strided_slice %1 {offsets = [0, 3], sizes = [6, 1], strides = [1, 1]} : vector<8x128xf32> to vector<6x1xf32>
    %6 = vector.extract_strided_slice %1 {offsets = [0, 4], sizes = [1, 1], strides = [1, 1]} : vector<8x128xf32> to vector<1x1xf32>
    %7 = vector.extract_strided_slice %1 {offsets = [0, 5], sizes = [1, 1], strides = [1, 1]} : vector<8x128xf32> to vector<1x1xf32>
    %8 = vector.extract_strided_slice %1 {offsets = [0, 6], sizes = [1, 1], strides = [1, 1]} : vector<8x128xf32> to vector<1x1xf32>
    %9 = vector.extract_strided_slice %0 {offsets = [0, 0], sizes = [1, 128], strides = [1, 1]} : vector<2x128xf32> to vector<1x128xf32>
    %10 = vector.extract_strided_slice %0 {offsets = [1, 0], sizes = [1, 128], strides = [1, 1]} : vector<2x128xf32> to vector<1x128xf32>
    %11 = vector.broadcast %2 : vector<6x1xf32> to vector<6x128xf32>
    %12 = vector.broadcast %9 : vector<1x128xf32> to vector<6x128xf32>
    %13 = arith.mulf %11, %12 : vector<6x128xf32>
    %14 = vector.broadcast %3 : vector<6x1xf32> to vector<6x128xf32>
    %15 = vector.broadcast %10 : vector<1x128xf32> to vector<6x128xf32>
    %16 = arith.mulf %14, %15 : vector<6x128xf32>
    %17 = arith.addf %13, %16 : vector<6x128xf32>
    %18 = vector.broadcast %4 : vector<6x1xf32> to vector<6x128xf32>
    %19 = arith.addf %17, %18 : vector<6x128xf32>
    %20 = math.tanh %19 : vector<6x128xf32>
    %21 = vector.broadcast %5 : vector<6x1xf32> to vector<6x128xf32>
    %22 = arith.mulf %21, %20 : vector<6x128xf32>
    %cst = arith.constant dense<0.000000e+00> : vector<128xf32>
    %23 = vector.multi_reduction <add>, %22, %cst [0] : vector<6x128xf32> to vector<128xf32>
    %24 = vector.shape_cast %23 : vector<128xf32> to vector<1x128xf32>
    %25 = vector.broadcast %6 : vector<1x1xf32> to vector<1x128xf32>
    %26 = arith.addf %24, %25 : vector<1x128xf32>
    %27 = math.tanh %26 : vector<1x128xf32>
    %28 = vector.broadcast %7 : vector<1x1xf32> to vector<1x128xf32>
    %29 = arith.mulf %28, %9 : vector<1x128xf32>
    %30 = vector.broadcast %8 : vector<1x1xf32> to vector<1x128xf32>
    %31 = arith.mulf %30, %10 : vector<1x128xf32>
    %32 = arith.addf %29, %31 : vector<1x128xf32>
    %33 = arith.mulf %27, %27 : vector<1x128xf32>
    %cst_3 = arith.constant 1.000000e+00 : f32
    %34 = vector.broadcast %cst_3 : f32 to vector<1x128xf32>
    %35 = arith.subf %34, %33 : vector<1x128xf32>
    %36 = vector.broadcast %35 : vector<1x128xf32> to vector<6x128xf32>
    %37 = vector.broadcast %5 : vector<6x1xf32> to vector<6x128xf32>
    %38 = arith.mulf %36, %37 : vector<6x128xf32>
    %39 = arith.mulf %20, %20 : vector<6x128xf32>
    %cst_4 = arith.constant 1.000000e+00 : f32
    %40 = vector.broadcast %cst_4 : f32 to vector<6x128xf32>
    %41 = arith.subf %40, %39 : vector<6x128xf32>
    %42 = arith.mulf %38, %41 : vector<6x128xf32>
    %43 = vector.broadcast %2 : vector<6x1xf32> to vector<6x128xf32>
    %44 = arith.mulf %42, %43 : vector<6x128xf32>
    %cst_5 = arith.constant dense<0.000000e+00> : vector<128xf32>
    %45 = vector.multi_reduction <add>, %44, %cst_5 [0] : vector<6x128xf32> to vector<128xf32>
    %46 = vector.shape_cast %45 : vector<128xf32> to vector<1x128xf32>
    %47 = vector.broadcast %3 : vector<6x1xf32> to vector<6x128xf32>
    %48 = arith.mulf %42, %47 : vector<6x128xf32>
    %cst_6 = arith.constant dense<0.000000e+00> : vector<128xf32>
    %49 = vector.multi_reduction <add>, %48, %cst_6 [0] : vector<6x128xf32> to vector<128xf32>
    %50 = vector.shape_cast %49 : vector<128xf32> to vector<1x128xf32>
    %51 = math.sin %9 : vector<1x128xf32>
    %cst_7 = arith.constant 6.075000e-02 : f32
    %52 = vector.broadcast %cst_7 : f32 to vector<1x128xf32>
    %53 = arith.mulf %52, %51 : vector<1x128xf32>
    %54 = arith.addf %53, %32 : vector<1x128xf32>
    %cst_8 = arith.constant 1.000000e-01 : f32
    %55 = vector.broadcast %cst_8 : f32 to vector<1x128xf32>
    %56 = arith.mulf %55, %10 : vector<1x128xf32>
    %57 = arith.subf %54, %56 : vector<1x128xf32>
    %cst_9 = arith.constant 26.666666 : f32
    %58 = vector.broadcast %cst_9 : f32 to vector<1x128xf32>
    %59 = arith.mulf %57, %58 : vector<1x128xf32>
    %60 = arith.mulf %46, %10 : vector<1x128xf32>
    %61 = arith.mulf %50, %59 : vector<1x128xf32>
    %62 = arith.addf %60, %61 : vector<1x128xf32>
    %cst_10 = arith.constant 0.000000e+00 : f32
    %63 = vector.broadcast %cst_10 : f32 to vector<1x128xf32>
    %64 = arith.subf %63, %62 : vector<1x128xf32>
    %cst_11 = arith.constant 0.00999999977 : f32
    %65 = vector.broadcast %cst_11 : f32 to vector<1x128xf32>
    %66 = arith.addf %64, %65 : vector<1x128xf32>
    %c0_12 = arith.constant 0 : index
    %c0_13 = arith.constant 0 : index
    %67 = vector.load %arg3[%c0_12, %c0_13] : memref<2x128xf32, #tpu.memory_space<vmem>>, vector<1x128xf32>
    tpu.vector_store %arg3[%c0_12, %c0_13], %27 {strides = array<i32>} : memref<2x128xf32, #tpu.memory_space<vmem>>, vector<1x128xf32>,
    %c1 = arith.constant 1 : index
    %c0_14 = arith.constant 0 : index
    %68 = vector.load %arg3[%c1, %c0_14] : memref<2x128xf32, #tpu.memory_space<vmem>>, vector<1x128xf32>
    tpu.vector_store %arg3[%c1, %c0_14], %66 {strides = array<i32>} : memref<2x128xf32, #tpu.memory_space<vmem>>, vector<1x128xf32>,
    return
  }
  func.func @transform_0(%arg0: i32) -> (i32, i32) {
    %c0_i32 = arith.constant 0 : i32
    %c0_i32_0 = arith.constant 0 : i32
    return %c0_i32, %arg0 : i32, i32
  }
  func.func @transform_1(%arg0: i32) -> (i32, i32) {
    %c0_i32 = arith.constant 0 : i32
    %c0_i32_0 = arith.constant 0 : i32
    %c0_i32_1 = arith.constant 0 : i32
    return %c0_i32, %c0_i32_0 : i32, i32
  }
  func.func @transform_2(%arg0: i32) -> (i32, i32) {
    %c0_i32 = arith.constant 0 : i32
    %c0_i32_0 = arith.constant 0 : i32
    return %c0_i32, %arg0 : i32, i32
  }
}

</mosaic_0001>

<bundles_post_ra>
// kernel: inverted_pendulum_forward.1
= control target key start
LH: loop header
LB: loop body
LE: loop exit
PB: predicated region body
PF: predicated region fallthrough
CT: control target
= control target key end

     0   :  { %s491_s9 = smov 0   ;;  %s588_s0 = inlined_call_operand.vmem [shape: f32[2,384], index: 0, kind: input, shape index: {}]   ;;  %s589_s1 = inlined_call_operand.vmem [shape: f32[8,128], index: 1, kind: input, shape index: {}]   ;;  %s590_s2 = inlined_call_operand.vmem [shape: f32[2,384], index: 2, kind: output, shape index: {}]  }
   0x1 LB: > { %s401_s10 = sadd.s32 4294967295, %s461_s9   ;;  %p405_p0 = scmp.ge.s32.totalorder %s461_s9, 1  ;;  %s461_s9 = sphi %s491_s9, %s12_s9  }
   0x2   : > { %p111_p1 = scmp.lt.s32.totalorder %s461_s9, 4 }
   0x4   : > { %p112_p2 = pnand %p405_p0, %p111_p1 }
   0x5   : > { %v140_v0 = vld [vmem:[%s589_s1] sm:$0xff] (!%p112_p2)  ;;  %v463_v1 = vmov (!%p112_p2), 0   ;;  %v464_v2 = vmov (!%p112_p2), 2   ;;  %v465_v3 = vmov (!%p112_p2), 1   ;;  %v466_v4 = vmov (!%p112_p2), 3   ;;  %p131_p3 = scmp.lt.s32.totalorder (!%p112_p2), %s401_s10, 2 }
   0x6   : > { %115 = sbr.rel (%p112_p2) target bundleno = 221 (0xdd), region = 28  ;;  %439 = vset.pattern.permute.xlu0 (!%p112_p2), %v463_v1  ;;  %441 = vset.pattern.permute.xlu1 (!%p112_p2), %v464_v2  ;;  %v467_v5 = vmov (!%p112_p2), 4   ;;  %v468_v6 = vmov (!%p112_p2), 5   ;;  %v469_v7 = vmov (!%p112_p2), 6   ;;  %v470_v16 = vmov (!%p112_p2), 2102212464  }
   0x7   : > { %143 = vperm.xlu0 (!%p112_p2), %439, %v140_v0   ;;  %162 = vperm.xlu1 (!%p112_p2), %441, %v140_v0   ;;  %v471_v18 = vmov (!%p112_p2), 920167782   ;;  %v472_v23 = vmov (!%p112_p2), 1326507024   ;;  %v473_v25 = vmov (!%p112_p2), 683565275  }
   0x8   : > { %v474_v27 = vmov (!%p112_p2), 2475754826   ;;  %v475_v30 = vmov (!%p112_p2), 2131351028   ;;  %vm172_vm7 = vcmask (!%p112_p2), 1045504  }
   0xb   : > { %440 = vset.pattern.permute.xlu0 (!%p112_p2), %v465_v3  ;;  %442 = vset.pattern.permute.xlu1 (!%p112_p2), %v466_v4 }
   0xc   : > { %152 = vperm.xlu0 (!%p112_p2), %440, %v140_v0   ;;  %168 = vperm.xlu1 (!%p112_p2), %442, %v140_v0  }
   0xd   : > { %s594_s10 = smov (!%p131_p3, %s401_s10), 2 }
   0xe   : > { %s406_s13 = sshll.u32 %s594_s10, 1 }
   0xf   : > { %s134_s16 = scalar_lea.vmem %s588_s0, %s406_s13  ;;  %s570_s19 = scalar_lea.vmem %s590_s2, %s406_s13 }
  0x10   : > { %443 = vset.pattern.permute.xlu1 %v467_v5  ;;  %444 = vset.pattern.permute.xlu0 %v468_v6  ;;  %v510_v8 = vld [vmem:[%s134_s16] sm:$0x3] }
  0x11   : > { %181 = vperm.xlu1 %443, %v140_v0   ;;  %187 = vperm.xlu0 %444, %v140_v0   ;;  %v229_v9 = vand.u32 2139095040, %v510_v8  ;;  %v226_v20 = vand.u32 2147483647, %v510_v8  ;;  %vm228_vm8 = vcmp.lt.s32.totalorder %v510_v8, 0  ;;  %vm318_vm13 = vweird.f32 %v510_v8 }
  0x13   : > { %v230_v10 = vshrl.u32 %v229_v9, 23  ;;  %v233_v35 = vand.u32 8388607, %v226_v20  ;;  %vm556_vm9 = vcmp.le.f32.partialorder %v226_v20, 0.7853982 }
  0x15   : > { %445 = vset.pattern.permute.xlu1 %v469_v7  ;;  %446 = vset.pattern.permute.xlu0 %v469_v7  ;;  %v408_v11 = vadd.s32 4294967169, %v230_v10  ;;  %v234_v41 = vor.u32 8388608, %v233_v35  ;;  %v146_v7 = vlaneseq }
  0x16   : > { %192 = vperm.xlu1 %445, %v140_v0  }
  0x17   : > { %v236_v12 = vadd.s32 1, %v408_v11  ;;  %v274_v47 = vshll.u32 %v234_v41, 8  ;;  %v537_v9 = vshrl.u32 %v146_v7, 7 }
  0x19   : > { %vm237_vm0 = vcmp.gt.s32.totalorder %v236_v12, 0  ;;  %v148_v11 = vsub.s32 0, %v537_v9 }
  0x1a   : > { %v238_v13 = vsel %vm237_vm0, %v236_v12, 0  ;;  %v157_v12 = vsub.s32 1, %v537_v9 }
  0x1b   : > { %v240_v14 = vand.u32 31, %v238_v13  ;;  %v239_v21 = vshrl.u32 %v238_v13, 5 }
  0x1d   : > { %v241_v15 = vsub.s32 32, %v240_v14  ;;  %v252_v17 = vshll.u32 %v470_v16, %v240_v14  ;;  %v255_v22 = vshll.u32 %v471_v18, %v240_v14  ;;  %v243_v26 = vshll.u32 %v473_v25, %v240_v14 }
  0x1e   : > { %v246_v28 = vshll.u32 %v474_v27, %v240_v14  ;;  %v249_v32 = vshll.u32 %v475_v30, %v240_v14  ;;  %vm261_vm1 = vcmp.lt.s32.totalorder %v239_v21, 4  ;;  %vm258_vm2 = vcmp.lt.s32.totalorder %v239_v21, 1 }
  0x1f   : > { %v253_v19 = vshrl.u32 %v471_v18, %v241_v15  ;;  %v256_v24 = vshrl.u32 %v472_v23, %v241_v15  ;;  %v244_v29 = vshrl.u32 %v474_v27, %v241_v15  ;;  %v247_v31 = vshrl.u32 %v475_v30, %v241_v15 }
  0x20   : > { %v250_v33 = vshrl.u32 %v470_v16, %v241_v15  ;;  %vm260_vm3 = vcmp.lt.s32.totalorder %v239_v21, 3  ;;  %vm259_vm4 = vcmp.lt.s32.totalorder %v239_v21, 2  ;;  %v242_v52 = vshrl.u32 %v473_v25, %v241_v15 }
  0x21   : > { %v254_v34 = vor.u32 %v253_v19, %v252_v17  ;;  %v257_v36 = vor.u32 %v256_v24, %v255_v22  ;;  %v245_v37 = vor.u32 %v244_v29, %v243_v26  ;;  %v248_v38 = vor.u32 %v247_v31, %v246_v28 }
  0x22   : > { %v251_v39 = vor.u32 %v250_v33, %v249_v32  ;;  %v149_v15 = vrot.slane %v510_v8, %v148_v11  ;;  %v158_v16 = vrot.slane %v510_v8, %v157_v12 }
  0x23   : > { %v267_v40 = vsel %vm261_vm1, %v254_v34, 920167782  ;;  %v271_v42 = vsel %vm261_vm1, %v257_v36, 1326507024  ;;  %v266_v43 = vsel %vm258_vm2, %v245_v37, %v248_v38  ;;  %v262_v56 = vsel %vm258_vm2, %v242_v52, %v245_v37 }
  0x24   : > { %v268_v44 = vsel %vm260_vm3, %v251_v39, %v267_v40  ;;  %v270_v45 = vsel %vm258_vm2, %v248_v38, %v251_v39  ;;  %v272_v46 = vsel %vm260_vm3, %v254_v34, %v271_v42  ;;  %v263_v55 = vsel %vm261_vm1, %v251_v39, 2102212464 }
  0x25   : > { %v269_v48 = vsel %vm259_vm4, %v266_v43, %v268_v44  ;;  %v273_v49 = vsel %vm259_vm4, %v270_v45, %v272_v46  ;;  %v264_v57 = vsel %vm260_vm3, %v248_v38, %v263_v55 }
  0x26   : > { %v524_v50 = vmul.u32.u64.low %v274_v47, %v269_v48  ;;  %v525_v51 = vmul.u32.u64.high %v274_v47, %v269_v48, %v524_v50  ;;  %v527_v53 = vmul.u32.u64.low %v274_v47, %v273_v49  ;;  %v528_v54 = vmul.u32.u64.high %v274_v47, %v273_v49, %v527_v53 }
  0x27   : > { %v265_v58 = vsel %vm259_vm4, %v262_v56, %v264_v57 }
  0x28   : > { %v284_v59 = vadd.s32 1, %v525_v51  ;;  %vm283_vm5 = vc.u32 %v528_v54, %v524_v50  ;;  %v281_v60 = vmul.u32 %v274_v47, %v265_v58  ;;  %v282_v17 = vadd.s32 %v524_v50, %v528_v54 }
  0x2a   : > { %v285_v61 = vsel %vm283_vm5, %v284_v59, %v525_v51 }
  0x2b   : > { %v286_v62 = vadd.s32 %v285_v61, %v281_v60 }
  0x2d   : > { %v287_v63 = vadd.s32 536870912, %v286_v62 }
  0x2f   : > { %v288_v0 = vshrl.u32 %v287_v63, 30  ;;  %v196_v63 = vrot.slane %v510_v8, 1 }
  0x31   : > { %v289_v1 = vshll.u32 %v288_v0, 30  ;;  %v312_v45 = vsub.s32 4, %v288_v0 }
  0x33   : > { %v290_v2 = vsub.s32 %v286_v62, %v289_v1  ;;  %v313_v49 = vsel %vm228_vm8, %v312_v45, %v288_v0 }
  0x34   : > { %v315_v20 = vsel %vm556_vm9, 0, %v313_v49 }
  0x35   : > { %v292_v3 = vsub.s32 0, %v290_v2  ;;  %v319_v53 = vadd.s32 3, %v315_v20 }
  0x37   : > { %v409_v4 = vmin.u32 %v292_v3, %v290_v2  ;;  %v320_v56 = vand.u32 3, %v319_v53 }
  0x39   : > { %v294_v5 = vclz %v409_v4  ;;  %vm322_vm10 = vcmp.eq.s32.totalorder %v320_v56, 0  ;;  %vm325_vm11 = vcmp.eq.s32.totalorder %v320_v56, 2  ;;  %vm321_vm12 = vcmp.lt.s32.totalorder %v320_v56, 2 }
  0x3b   : > { %v410_v6 = vadd.s32 4294967294, %v294_v5 }
  0x3d   : > { %vm411_vm6 = vcmp.lt.s32.totalorder %v410_v6, 0 }
  0x3e   : > { %v297_v10 = vsel %vm411_vm6, 0, %v410_v6 }
  0x3f   : > { %v302_v13 = vsub.s32 4294967266, %v297_v10  ;;  %v298_v18 = vsub.s32 32, %v297_v10  ;;  %v299_v25 = vshll.u32 %v290_v2, %v297_v10 }
  0x41   : > { %v303_v19 = vadd.s32 127, %v302_v13  ;;  %v300_v26 = vshrl.u32 %v282_v17, %v298_v18  ;;  %v332_v18 = vmul.f32 0.1, %v510_v8 }
  0x43   : > { %v304_v27 = vshll.u32 %v303_v19, 23  ;;  %v301_v30 = vor.u32 %v300_v26, %v299_v25  ;;  %v334_v26 = vrot.slane %v332_v18, 1 }
  0x45   : > { %v305_v31 = vor.u32 4788187, %v304_v27  ;;  %v308_v33 = vcvt.s32.f32 %v301_v30 }
  0x47   : > { %v306_v32 = vand.u32 2147483647, %v305_v31 }
  0x49   : > { %v309_v34 = vmul.f32 %v308_v33, %v306_v32 }
  0x4b   : > { %v310_v38 = vxor.u32 2147483648, %v309_v34 }
  0x4d   : > { %v311_v42 = vsel %vm228_vm8, %v310_v38, %v309_v34 }
  0x4e   : > { %v314_v46 = vsel %vm556_vm9, %v510_v8, %v311_v42 }
  0x86   : > { %v541_v14 = vpop.permute.xlu0 %143  ;;  %v163_v24 = vpop.permute.xlu1 %162 }
  0x87   : > { %v150_v22 = vmul.f32 %v149_v15, %v541_v14 }
  0x8b   : > { %v548_v21 = vpop.permute.xlu0 %152  ;;  %v169_v35 = vpop.permute.xlu1 %168 }
  0x8c   : > { %v159_v23 = vmul.f32 %v158_v16, %v548_v21 }
  0x8e   : > { %v160_v28 = vadd.f32 %v159_v23, %v150_v22 }
  0x90   : > { %v165_v29 = vadd.f32 %v163_v24, %v160_v28  ;;  %v182_v50 = vpop.permute.xlu1 %181  ;;  %v188_v3 = vpop.permute.xlu0 %187 }
  0x91   : > { %v190_v7 = vmul.f32 %v188_v3, %v510_v8 }
  0x92   : > { %447 = vtanh.f32 %v165_v29 }
  0x93   : > { %449 = vcosq.f32 %v314_v46 }
  0x94   : > { %451 = vsinq.f32 %v314_v46 }
  0x95   : > { %v193_v2 = vpop.permute.xlu1 %192 }
  0x96   : > { %v198_v6 = vmul.f32 %v196_v63, %v193_v2 }
  0x98   : > { %v199_v16 = vadd.f32 %v198_v6, %v190_v7 }
  0x9c   : > { %v448_v36 = vpop.eup %447 }
  0x9d   : > { %v171_v37 = vmul.f32 %v448_v36, %v169_v35  ;;  %v450_v54 = vpop.eup %449  ;;  %v207_v0 = vmul.f32 %v448_v36, %v448_v36 }
  0x9e   : > { %v452_v55 = vpop.eup %451  ;;  %v326_v58 = vxor.u32 2147483648, %v450_v54 }
  0x9f   : > { %v173_v39 = vsel %vm172_vm7, %v171_v37, 0.0  ;;  %v323_v57 = vxor.u32 2147483648, %v452_v55  ;;  %v208_v10 = vsub.f32 1.0, %v207_v0 }
  0xa0   : > { %v174_v40 = vrot.slane %v173_v39, 4  ;;  %v327_v62 = vsel %vm325_vm11, %v326_v58, %v452_v55 }
  0xa1   : > { %v324_v61 = vsel %vm322_vm10, %v450_v54, %v323_v57 }
  0xa2   : > { %v175_v43 = vadd.f32 %v174_v40, %v173_v39  ;;  %v328_v4 = vsel %vm321_vm12, %v324_v61, %v327_v62 }
  0xa3   : > { %v329_v13 = vsel %vm318_vm13, nan, %v328_v4 }
  0xa4   : > { %v176_v44 = vrot.slane %v175_v43, 2  ;;  %v330_v17 = vmul.f32 0.06075, %v329_v13 }
  0xa6   : > { %v177_v47 = vadd.f32 %v176_v44, %v175_v43  ;;  %v331_v25 = vadd.f32 %v330_v17, %v199_v16 }
  0xa8   : > { %v178_v48 = vrot.slane %v177_v47, 1  ;;  %v336_v31 = vsub.f32 %v331_v25, %v334_v26 }
  0xaa   : > { %v179_v51 = vadd.f32 %v178_v48, %v177_v47 }
  0xac   : > { %v184_v52 = vadd.f32 %v182_v50, %v179_v51 }
  0xae   : > { %453 = vtanh.f32 %v184_v52 }
  0xb8   : > { %v454_v59 = vpop.eup %453 }
  0xb9   : > { %v200_v60 = vmul.f32 %v454_v59, %v454_v59  ;;  %346 = vst [vmem:[%s570_s19] sm:$0x1] %v454_v59 }
  0xbb   : > { %v201_v1 = vsub.f32 1.0, %v200_v60 }
  0xbd   : > { %v205_v5 = vrot.slane %v201_v1, %v148_v11 }
  0xbf   : > { %v206_v12 = vmul.f32 %v205_v5, %v169_v35  ;;  %v337_v35 = vmul.f32 26.666666, %v336_v31 }
  0xc1   : > { %v209_v15 = vmul.f32 %v208_v10, %v206_v12 }
  0xc3   : > { %v210_v19 = vmul.f32 %v209_v15, %v541_v14  ;;  %v218_v22 = vmul.f32 %v209_v15, %v548_v21 }
  0xc5   : > { %v211_v23 = vsel %vm172_vm7, %v210_v19, 0.0  ;;  %v219_v9 = vsel %vm172_vm7, %v218_v22, 0.0 }
  0xc6   : > { %v212_v11 = vrot.slane %v211_v23, 4  ;;  %v220_v24 = vrot.slane %v219_v9, 4 }
  0xc8   : > { %v213_v27 = vadd.f32 %v212_v11, %v211_v23  ;;  %v221_v28 = vadd.f32 %v220_v24, %v219_v9 }
  0xca   : > { %v214_v29 = vrot.slane %v213_v27, 2  ;;  %v222_v30 = vrot.slane %v221_v28, 2 }
  0xcc   : > { %v215_v32 = vadd.f32 %v214_v29, %v213_v27  ;;  %v223_v33 = vadd.f32 %v222_v30, %v221_v28 }
  0xce   : > { %v216_v34 = vrot.slane %v215_v32, 1  ;;  %v224_v14 = vrot.slane %v223_v33, 1 }
  0xd0   : > { %v217_v21 = vadd.f32 %v216_v34, %v215_v32  ;;  %v225_v36 = vadd.f32 %v224_v14, %v223_v33 }
  0xd2   : > { %v339_v37 = vmul.f32 %v337_v35, %v225_v36  ;;  %v338_v38 = vmul.f32 %v217_v21, %v510_v8 }
  0xd4   : > { %v341_v39 = vrot.slane %v339_v37, 7 }
  0xd6   : > { %v343_v40 = vadd.f32 %v341_v39, %v338_v38 }
  0xd8   : > { %v344_v41 = vsub.f32 0.0, %v343_v40 }
  0xda   : > { %v345_v42 = vadd.f32 0.01, %v344_v41 }
  0xdc   : > { %347 = vst [vmem:[%s570_s19] sm:$0x2] %v345_v42 }
  0xdd PF: > { %s12_s9 = sadd.s32 1, %s461_s9  }
  0xde   : > { %p9_p4 = scmp.ge.s32.totalorder %s12_s9, 5  }
  0xe0   :  { %11 = sbr.rel (!%p9_p4) target bundleno = 1 (0x1), region = 58 }

</bundles_post_ra>
